<compile_context>
chip_gen: v5e
topology: v5e:2x2
jax: 0.10.0
libtpu: 0.0.40
codegen_flags: <defaults>
</compile_context>

<pallas_src>
import functools

import jax
import jax.numpy as jnp
from jax.experimental import pallas as pl
from jax.experimental.pallas import tpu as pltpu


# ---------------------------------------------------------------------------
# Pallas kernel: whole 3-layer forward fused, one batch tile per grid step.
# ---------------------------------------------------------------------------
def policy_mlp_kernel(s_ref, g_ref, w1s_ref, w1g_ref, b1_ref, w2_ref, b2_ref,
                      w3_ref, b3_ref, out_ref):
    # state / goal arrive as f32 tiles; cast to bf16 in VMEM for the MXU.
    s = s_ref[...].astype(jnp.bfloat16)
    g = g_ref[...].astype(jnp.bfloat16)

    # Layer 1 with the concat folded into the weights:
    #   cat([s, g - s]) @ W1 == s @ (W1a - W1b) + g @ W1b
    h = (jnp.dot(s, w1s_ref[...], preferred_element_type=jnp.float32)
         + jnp.dot(g, w1g_ref[...], preferred_element_type=jnp.float32)
         + b1_ref[...])
    h = jnp.maximum(h.astype(jnp.bfloat16), 0)          # bf16 ReLU

    # Layer 2
    h = jnp.dot(h, w2_ref[...], preferred_element_type=jnp.float32) + b2_ref[...]
    h = jnp.maximum(h.astype(jnp.bfloat16), 0)

    # Layer 3 (8-wide head). Block last dim == full array extent, so a direct
    # narrow store is legal; keeps output HBM traffic at its true size.
    out_ref[...] = (jnp.dot(h, w3_ref[...], preferred_element_type=jnp.float32)
                    + b3_ref[...])


# ---------------------------------------------------------------------------
# Wrapper: batch-tiled grid, weights resident in VMEM across grid steps.
# ---------------------------------------------------------------------------
def _tile_plan(batch):
    """Pick (num_tiles, tile_b).  >=2 tiles for large batches so v7x's two
    TensorCores both get work; a single tile otherwise (v5e/v6e: single TC,
    fewer grid steps = less per-step overhead)."""
    num_tiles = 2 if batch >= 512 else 1
    tile_b = -(-batch // num_tiles)          # cdiv
    tile_b = ((tile_b + 7) // 8) * 8         # sublane multiple of 8
    return num_tiles, tile_b


@jax.jit
def policy_forward(state, goal, params):
    """state, goal: [batch, state_dim] f32; returns [batch, out_dim] f32."""
    batch, state_dim = state.shape
    w1s, w1g, b1 = params["w1s"], params["w1g"], params["b1"]
    w2, b2 = params["w2"], params["b2"]
    w3, b3 = params["w3"], params["b3"]
    d1, d2, out_dim = w1s.shape[1], w2.shape[1], w3.shape[1]

    num_tiles, tile_b = _tile_plan(batch)
    padded_batch = num_tiles * tile_b
    if padded_batch != batch:                # only for ragged batches
        pad = ((0, padded_batch - batch), (0, 0))
        state = jnp.pad(state, pad)
        goal = jnp.pad(goal, pad)

    def resident(shape):                     # weights: same block every step
        return pl.BlockSpec(shape, lambda i: (0, 0))

    cost = pl.CostEstimate(
        flops=2 * padded_batch * (2 * state_dim * d1 + d1 * d2 + d2 * out_dim),
        transcendentals=0,
        bytes_accessed=(state.size * 4 + goal.size * 4
                        + (w1s.size + w1g.size + w2.size + w3.size) * 2
                        + (b1.size + b2.size + b3.size) * 4
                        + padded_batch * out_dim * 4),
    )

    out = pl.pallas_call(
        policy_mlp_kernel,
        out_shape=jax.ShapeDtypeStruct((padded_batch, out_dim), jnp.float32),
        grid=(num_tiles,),
        in_specs=[
            pl.BlockSpec((tile_b, state_dim), lambda i: (i, 0)),   # state
            pl.BlockSpec((tile_b, state_dim), lambda i: (i, 0)),   # goal
            resident(w1s.shape), resident(w1g.shape), resident(b1.shape),
            resident(w2.shape), resident(b2.shape),
            resident(w3.shape), resident(b3.shape),
        ],
        out_specs=pl.BlockSpec((tile_b, out_dim), lambda i: (i, 0)),
        compiler_params=pltpu.CompilerParams(
            # TODO(synk): on v7x, verify megacore sharding in the dump and
            # switch to pltpu.CORE_PARALLEL if "parallel" does not shard.
            dimension_semantics=("parallel",)),
        cost_estimate=cost,
    )(state, goal, w1s, w1g, b1, w2, b2, w3, b3)

    if padded_batch != batch:
        out = out[:batch]
    return out


# ---------------------------------------------------------------------------
# Deterministic parameter construction (synthetic; matches module shapes).
# ---------------------------------------------------------------------------
def make_params(key, input_dim, output_dim, depth):
    assert depth == 3, "this script instantiates the cf.depth == 3 configuration"
    dims = [input_dim, input_dim * 2, input_dim * 4, output_dim]
    keys = jax.random.split(key, 6)

    def linear(kw, kb, fan_in, fan_out):
        bound = 1.0 / jnp.sqrt(fan_in)
        w = jax.random.uniform(kw, (fan_in, fan_out), jnp.float32, -bound, bound)
        b = jax.random.uniform(kb, (1, fan_out), jnp.float32, -bound, bound)
        return w, b

    w1, b1 = linear(keys[0], keys[1], dims[0], dims[1])
    w2, b2 = linear(keys[2], keys[3], dims[1], dims[2])
    w3, b3 = linear(keys[4], keys[5], dims[2], dims[3])

    half = input_dim // 2
    # Fold the concat:  cat([s, g-s]) @ W1 == s @ (W1a - W1b) + g @ W1b
    kernel_params = {
        "w1s": (w1[:half] - w1[half:]).astype(jnp.bfloat16),
        "w1g": w1[half:].astype(jnp.bfloat16),
        "b1": b1,                                   # biases stay f32 (f32 epilogue)
        "w2": w2.astype(jnp.bfloat16),
        "b2": b2,
        "w3": w3.astype(jnp.bfloat16),
        "b3": b3,
    }
    ref_params = {"w1": w1, "b1": b1, "w2": w2, "b2": b2, "w3": w3, "b3": b3}
    return kernel_params, ref_params


def policy_reference(state, goal, p):
    """Pure-JAX f32 reference mirroring the PyTorch forward exactly."""
    inp = jnp.concatenate([state, goal - state], axis=-1)
    h = jnp.maximum(inp @ p["w1"] + p["b1"], 0.0)
    h = jnp.maximum(h @ p["w2"] + p["b2"], 0.0)
    return h @ p["w3"] + p["b3"]


if __name__ == "__main__":
    # Configuration implied by the module: cf.depth = 3, input_dim = 32
    # (state/goal each 16 features), output_dim = 8.  Batch of 512 fused
    # rollout rows -> 2 grid tiles of 256 rows each.
    depth = 3
    input_dim = 32          # dimension AFTER concatenation
    state_dim = input_dim // 2
    output_dim = 8
    batch = 512

    root = jax.random.PRNGKey(0)
    k_state, k_goal, k_params = jax.random.split(root, 3)

    state = jax.random.normal(k_state, (batch, state_dim), jnp.float32)
    goal = jax.random.normal(k_goal, (batch, state_dim), jnp.float32)
    kernel_params, ref_params = make_params(k_params, input_dim, output_dim, depth)

    out = policy_forward(state, goal, kernel_params)
    out = jax.block_until_ready(out)

    ref = policy_reference(state, goal, ref_params)
    assert out.shape == (batch, output_dim)
    # bf16 matmul inputs vs f32 reference -> loosened tolerance.
    assert jnp.allclose(out, ref, atol=5e-2, rtol=5e-2), (
        "mismatch vs reference: max abs err = "
        f"{float(jnp.max(jnp.abs(out - ref)))}")

    print("KERNEL_OK")
</pallas_src>

<mosaic_0001>
module attributes {stable_mosaic.version = 11 : i64} {
  func.func @policy_mlp_kernel(%arg0: i32, %arg1: memref<256x16xf32, #tpu.memory_space<vmem>>, %arg2: memref<256x16xf32, #tpu.memory_space<vmem>>, %arg3: memref<16x64xbf16, #tpu.memory_space<vmem>>, %arg4: memref<16x64xbf16, #tpu.memory_space<vmem>>, %arg5: memref<1x64xf32, #tpu.memory_space<vmem>>, %arg6: memref<64x128xbf16, #tpu.memory_space<vmem>>, %arg7: memref<1x128xf32, #tpu.memory_space<vmem>>, %arg8: memref<128x8xbf16, #tpu.memory_space<vmem>>, %arg9: memref<1x8xf32, #tpu.memory_space<vmem>>, %arg10: memref<256x8xf32, #tpu.memory_space<vmem>>) attributes {dimension_semantics = [#tpu.dimension_semantics<parallel>], iteration_bounds = array<i64: 2>, scalar_prefetch = 0 : i64, scratch_operands = 0 : i64, tpu.core_type = #tpu.core_type<tc>, window_params = [{transform_indices = @transform_0, window_bounds = array<i64: 256, 16>}, {transform_indices = @transform_1, window_bounds = array<i64: 256, 16>}, {pipeline_mode = #tpu.pipeline_mode<synchronous>, transform_indices = @transform_2, window_bounds = array<i64: 16, 64>}, {pipeline_mode = #tpu.pipeline_mode<synchronous>, transform_indices = @transform_3, window_bounds = array<i64: 16, 64>}, {pipeline_mode = #tpu.pipeline_mode<synchronous>, transform_indices = @transform_4, window_bounds = array<i64: 1, 64>}, {pipeline_mode = #tpu.pipeline_mode<synchronous>, transform_indices = @transform_5, window_bounds = array<i64: 64, 128>}, {pipeline_mode = #tpu.pipeline_mode<synchronous>, transform_indices = @transform_6, window_bounds = array<i64: 1, 128>}, {pipeline_mode = #tpu.pipeline_mode<synchronous>, transform_indices = @transform_7, window_bounds = array<i64: 128, 8>}, {pipeline_mode = #tpu.pipeline_mode<synchronous>, transform_indices = @transform_8, window_bounds = array<i64: 1, 8>}, {transform_indices = @transform_9, window_bounds = array<i64: 256, 8>}]} {
    %c0 = arith.constant 0 : index
    %c0_0 = arith.constant 0 : index
    %0 = vector.load %arg1[%c0, %c0_0] : memref<256x16xf32, #tpu.memory_space<vmem>>, vector<256x16xf32>
    %1 = arith.truncf %0 : vector<256x16xf32> to vector<256x16xbf16>
    %c0_1 = arith.constant 0 : index
    %c0_2 = arith.constant 0 : index
    %2 = vector.load %arg2[%c0_1, %c0_2] : memref<256x16xf32, #tpu.memory_space<vmem>>, vector<256x16xf32>
    %3 = arith.truncf %2 : vector<256x16xf32> to vector<256x16xbf16>
    %c0_3 = arith.constant 0 : index
    %c0_4 = arith.constant 0 : index
    %4 = vector.load %arg3[%c0_3, %c0_4] : memref<16x64xbf16, #tpu.memory_space<vmem>>, vector<16x64xbf16>
    %cst = arith.constant dense<0.000000e+00> : vector<256x64xf32>
    %5 = tpu.matmul %1, %4, %cst {dimension_numbers = #tpu.dot_dimension_numbers<[1], [0], [0], [1], [0, 0, 1, 1], [], []>} : vector<256x16xbf16>, vector<16x64xbf16>, vector<256x64xf32> -> vector<256x64xf32>
    %c0_5 = arith.constant 0 : index
    %c0_6 = arith.constant 0 : index
    %6 = vector.load %arg4[%c0_5, %c0_6] : memref<16x64xbf16, #tpu.memory_space<vmem>>, vector<16x64xbf16>
    %cst_7 = arith.constant dense<0.000000e+00> : vector<256x64xf32>
    %7 = tpu.matmul %3, %6, %cst_7 {dimension_numbers = #tpu.dot_dimension_numbers<[1], [0], [0], [1], [0, 0, 1, 1], [], []>} : vector<256x16xbf16>, vector<16x64xbf16>, vector<256x64xf32> -> vector<256x64xf32>
    %8 = arith.addf %5, %7 : vector<256x64xf32>
    %c0_8 = arith.constant 0 : index
    %c0_9 = arith.constant 0 : index
    %9 = vector.load %arg5[%c0_8, %c0_9] : memref<1x64xf32, #tpu.memory_space<vmem>>, vector<1x64xf32>
    %10 = vector.broadcast %9 : vector<1x64xf32> to vector<256x64xf32>
    %11 = arith.addf %8, %10 : vector<256x64xf32>
    %12 = arith.truncf %11 : vector<256x64xf32> to vector<256x64xbf16>
    %cst_10 = arith.constant 0.000000e+00 : bf16
    %13 = vector.broadcast %cst_10 : bf16 to vector<256x64xbf16>
    %14 = arith.maximumf %12, %13 : vector<256x64xbf16>
    %c0_11 = arith.constant 0 : index
    %c0_12 = arith.constant 0 : index
    %15 = vector.load %arg6[%c0_11, %c0_12] : memref<64x128xbf16, #tpu.memory_space<vmem>>, vector<64x128xbf16>
    %cst_13 = arith.constant dense<0.000000e+00> : vector<256x128xf32>
    %16 = tpu.matmul %14, %15, %cst_13 {dimension_numbers = #tpu.dot_dimension_numbers<[1], [0], [0], [1], [0, 0, 1, 1], [], []>} : vector<256x64xbf16>, vector<64x128xbf16>, vector<256x128xf32> -> vector<256x128xf32>
    %c0_14 = arith.constant 0 : index
    %c0_15 = arith.constant 0 : index
    %17 = vector.load %arg7[%c0_14, %c0_15] : memref<1x128xf32, #tpu.memory_space<vmem>>, vector<1x128xf32>
    %18 = vector.broadcast %17 : vector<1x128xf32> to vector<256x128xf32>
    %19 = arith.addf %16, %18 : vector<256x128xf32>
    %20 = arith.truncf %19 : vector<256x128xf32> to vector<256x128xbf16>
    %cst_16 = arith.constant 0.000000e+00 : bf16
    %21 = vector.broadcast %cst_16 : bf16 to vector<256x128xbf16>
    %22 = arith.maximumf %20, %21 : vector<256x128xbf16>
    %c0_17 = arith.constant 0 : index
    %c0_18 = arith.constant 0 : index
    %23 = vector.load %arg8[%c0_17, %c0_18] : memref<128x8xbf16, #tpu.memory_space<vmem>>, vector<128x8xbf16>
    %cst_19 = arith.constant dense<0.000000e+00> : vector<256x8xf32>
    %24 = tpu.matmul %22, %23, %cst_19 {dimension_numbers = #tpu.dot_dimension_numbers<[1], [0], [0], [1], [0, 0, 1, 1], [], []>} : vector<256x128xbf16>, vector<128x8xbf16>, vector<256x8xf32> -> vector<256x8xf32>
    %c0_20 = arith.constant 0 : index
    %c0_21 = arith.constant 0 : index
    %25 = vector.load %arg9[%c0_20, %c0_21] : memref<1x8xf32, #tpu.memory_space<vmem>>, vector<1x8xf32>
    %26 = vector.broadcast %25 : vector<1x8xf32> to vector<256x8xf32>
    %27 = arith.addf %24, %26 : vector<256x8xf32>
    %c0_22 = arith.constant 0 : index
    %c0_23 = arith.constant 0 : index
    %28 = vector.load %arg10[%c0_22, %c0_23] : memref<256x8xf32, #tpu.memory_space<vmem>>, vector<256x8xf32>
    tpu.vector_store %arg10[%c0_22, %c0_23], %27 {strides = array<i32>} : memref<256x8xf32, #tpu.memory_space<vmem>>, vector<256x8xf32>,
    return
  }
  func.func @transform_0(%arg0: i32) -> (i32, i32) {
    %c0_i32 = arith.constant 0 : i32
    %c0_i32_0 = arith.constant 0 : i32
    return %arg0, %c0_i32 : i32, i32
  }
  func.func @transform_1(%arg0: i32) -> (i32, i32) {
    %c0_i32 = arith.constant 0 : i32
    %c0_i32_0 = arith.constant 0 : i32
    return %arg0, %c0_i32 : i32, i32
  }
  func.func @transform_2(%arg0: i32) -> (i32, i32) {
    %c0_i32 = arith.constant 0 : i32
    %c0_i32_0 = arith.constant 0 : i32
    %c0_i32_1 = arith.constant 0 : i32
    return %c0_i32, %c0_i32_0 : i32, i32
  }
  func.func @transform_3(%arg0: i32) -> (i32, i32) {
    %c0_i32 = arith.constant 0 : i32
    %c0_i32_0 = arith.constant 0 : i32
    %c0_i32_1 = arith.constant 0 : i32
    return %c0_i32, %c0_i32_0 : i32, i32
  }
  func.func @transform_4(%arg0: i32) -> (i32, i32) {
    %c0_i32 = arith.constant 0 : i32
    %c0_i32_0 = arith.constant 0 : i32
    %c0_i32_1 = arith.constant 0 : i32
    return %c0_i32, %c0_i32_0 : i32, i32
  }
  func.func @transform_5(%arg0: i32) -> (i32, i32) {
    %c0_i32 = arith.constant 0 : i32
    %c0_i32_0 = arith.constant 0 : i32
    %c0_i32_1 = arith.constant 0 : i32
    return %c0_i32, %c0_i32_0 : i32, i32
  }
  func.func @transform_6(%arg0: i32) -> (i32, i32) {
    %c0_i32 = arith.constant 0 : i32
    %c0_i32_0 = arith.constant 0 : i32
    %c0_i32_1 = arith.constant 0 : i32
    return %c0_i32, %c0_i32_0 : i32, i32
  }
  func.func @transform_7(%arg0: i32) -> (i32, i32) {
    %c0_i32 = arith.constant 0 : i32
    %c0_i32_0 = arith.constant 0 : i32
    %c0_i32_1 = arith.constant 0 : i32
    return %c0_i32, %c0_i32_0 : i32, i32
  }
  func.func @transform_8(%arg0: i32) -> (i32, i32) {
    %c0_i32 = arith.constant 0 : i32
    %c0_i32_0 = arith.constant 0 : i32
    %c0_i32_1 = arith.constant 0 : i32
    return %c0_i32, %c0_i32_0 : i32, i32
  }
  func.func @transform_9(%arg0: i32) -> (i32, i32) {
    %c0_i32 = arith.constant 0 : i32
    %c0_i32_0 = arith.constant 0 : i32
    return %arg0, %c0_i32 : i32, i32
  }
}

</mosaic_0001>

<bundles_post_ra>
// kernel: policy_forward.1
= control target key start
LH: loop header
LB: loop body
LE: loop exit
PB: predicated region body
PF: predicated region fallthrough
CT: control target
= control target key end

     0   :  { %s1646_s30 = smov 0   ;;  %s2006_s0 = inlined_call_operand.vmem [shape: f32[512,16], index: 0, kind: input, shape index: {}]   ;;  %s2007_s1 = inlined_call_operand.vmem [shape: f32[512,16], index: 1, kind: input, shape index: {}]   ;;  %s2008_s2 = inlined_call_operand.vmem [shape: bf16[16,64], index: 2, kind: input, shape index: {}]   ;;  %s2009_s3 = inlined_call_operand.vmem [shape: bf16[16,64], index: 3, kind: input, shape index: {}]   ;;  %s2010_s4 = inlined_call_operand.vmem [shape: f32[1,64], index: 4, kind: input, shape index: {}]   ;;  %s2011_s5 = inlined_call_operand.vmem [shape: bf16[64,128], index: 5, kind: input, shape index: {}]   ;;  %s2012_s6 = inlined_call_operand.vmem [shape: f32[1,128], index: 6, kind: input, shape index: {}]   ;;  %s2013_s7 = inlined_call_operand.vmem [shape: bf16[128,8], index: 7, kind: input, shape index: {}]   ;;  %s2014_s8 = inlined_call_operand.vmem [shape: f32[1,8], index: 8, kind: input, shape index: {}]   ;;  %s2015_s9 = inlined_call_operand.vmem [shape: f32[512,8], index: 9, kind: output, shape index: {}]  }
   0x1 LB: > { %s1438_s10 = sadd.s32 4294967295, %s1594_s30   ;;  %p1442_p0 = scmp.ge.s32.totalorder %s1594_s30, 1  ;;  %s1594_s30 = sphi %s1646_s30, %s19_s30  }
   0x2   : > { %p299_p1 = scmp.lt.s32.totalorder %s1594_s30, 3 }
   0x4   : > { %p300_p2 = pnand %p1442_p0, %p299_p1 }
   0x5   : > { %s1443_s15 = sshll.u32 (!%p300_p2), %s1438_s10, 5 }
   0x6   : > { %303 = sbr.rel (%p300_p2) target bundleno = 689 (0x2b1), region = 56  ;;  %p341_p3 = scmp.lt.s32.totalorder (!%p300_p2), %s1443_s15, 63 }
   0xb   : > { %v1556_v0 = vld [vmem:[%s2009_s3] sm:$0xff]  ;;  %s2017_s15 = smov (!%p341_p3, %s1443_s15), 63  ;;  %vm465_vm0 = vcmask 130048   ;;  %v1560_v44 = vld [vmem:[%s2011_s5 + $0x18] sm:$0xff]  ;;  %v1559_v45 = vld [vmem:[%s2011_s5 + $0x10] sm:$0xff]  ;;  %vm930_vm1 = vcmask 523264  }
   0xc   : > { %v1555_v1 = vld [vmem:[%s2008_s2] sm:$0xff]  ;;  %521 = vmatpush.bf16.msra.mxu0 %v1556_v0  ;;  %s1660_s16 = sshll.u32 %s2017_s15, 3  ;;  %983 = vmatpush.bf16.msra.mxu2 %v1560_v44  ;;  %v1558_v46 = vld [vmem:[%s2011_s5 + $0x8] sm:$0xff]  ;;  %vm1337_vm2 = vcmask 64512  }
   0xd   : > { %664 = vmatpush.bf16.msra.mxu1 %v1555_v1  ;;  %s1666_s19 = scalar_lea.vmem %s2007_s1, %s1660_s16  ;;  %s1672_s22 = scalar_lea.vmem %s2006_s0, %s1660_s16  ;;  %v1557_v51 = vld [vmem:[%s2011_s5] sm:$0xff] }
   0xe   : > { %v407_v2 = vld [vmem:[%s1666_s19] sm:$0xff]  ;;  %v408_v3 = vld [vmem:[%s1666_s19 + $0x8] sm:$0xff]  ;;  %v409_v8 = vld [vmem:[%s1666_s19 + $0x10] sm:$0xff]  ;;  %s1891_s17 = scalar_lea.vmem %s2015_s9, %s1660_s16 }
   0xf   : > { %v359_v4 = vld [vmem:[%s1672_s22] sm:$0xff]  ;;  %v439_v5 = vpack.c.bf16 %v408_v3, %v407_v2  ;;  %v360_v6 = vld [vmem:[%s1672_s22 + $0x8] sm:$0xff]  ;;  %v410_v9 = vld [vmem:[%s1666_s19 + $0x18] sm:$0xff] }
  0x10   : > { %v391_v7 = vpack.c.bf16 %v360_v6, %v359_v4  ;;  %v361_v10 = vld [vmem:[%s1672_s22 + $0x10] sm:$0xff]  ;;  %v362_v11 = vld [vmem:[%s1672_s22 + $0x18] sm:$0xff]  ;;  %v440_v12 = vpack.c.bf16 %v410_v9, %v409_v8  ;;  %v411_v14 = vld [vmem:[%s1666_s19 + $0x20] sm:$0xff]  ;;  %984 = vmatpush.bf16.msra.mxu2 %v1559_v45 }
  0x11   : > { %1453 = vmatmul.msk.bf16.vlgmr.msra.gmra.mxu0 %vm465_vm0, %v439_v5  ;;  %v392_v13 = vpack.c.bf16 %v362_v11, %v361_v10  ;;  %v412_v15 = vld [vmem:[%s1666_s19 + $0x28] sm:$0xff]  ;;  %v363_v16 = vld [vmem:[%s1672_s22 + $0x20] sm:$0xff]  ;;  %v413_v20 = vld [vmem:[%s1666_s19 + $0x30] sm:$0xff] }
  0x12   : > { %1473 = vmatmul.msk.bf16.vlgmr.msra.gmra.mxu1 %vm465_vm0, %v391_v7  ;;  %v364_v17 = vld [vmem:[%s1672_s22 + $0x28] sm:$0xff]  ;;  %v441_v18 = vpack.c.bf16 %v412_v15, %v411_v14  ;;  %v414_v21 = vld [vmem:[%s1666_s19 + $0x38] sm:$0xff]  ;;  %v365_v22 = vld [vmem:[%s1672_s22 + $0x30] sm:$0xff] }
  0x13   : > { %v393_v19 = vpack.c.bf16 %v364_v17, %v363_v16  ;;  %v366_v23 = vld [vmem:[%s1672_s22 + $0x38] sm:$0xff]  ;;  %v442_v24 = vpack.c.bf16 %v414_v21, %v413_v20  ;;  %v415_v26 = vld [vmem:[%s1666_s19 + $0x40] sm:$0xff]  ;;  %v416_v27 = vld [vmem:[%s1666_s19 + $0x48] sm:$0xff] }
  0x14   : > { %v394_v25 = vpack.c.bf16 %v366_v23, %v365_v22  ;;  %v367_v28 = vld [vmem:[%s1672_s22 + $0x40] sm:$0xff]  ;;  %v368_v29 = vld [vmem:[%s1672_s22 + $0x48] sm:$0xff]  ;;  %v443_v30 = vpack.c.bf16 %v416_v27, %v415_v26  ;;  %v417_v32 = vld [vmem:[%s1666_s19 + $0x50] sm:$0xff]  ;;  %985 = vmatpush.bf16.msra.mxu2 %v1558_v46 }
  0x15   : > { %v395_v31 = vpack.c.bf16 %v368_v29, %v367_v28  ;;  %v418_v33 = vld [vmem:[%s1666_s19 + $0x58] sm:$0xff]  ;;  %v369_v34 = vld [vmem:[%s1672_s22 + $0x50] sm:$0xff]  ;;  %v419_v38 = vld [vmem:[%s1666_s19 + $0x60] sm:$0xff] }
  0x16   : > { %v370_v35 = vld [vmem:[%s1672_s22 + $0x58] sm:$0xff]  ;;  %v444_v36 = vpack.c.bf16 %v418_v33, %v417_v32  ;;  %v420_v39 = vld [vmem:[%s1666_s19 + $0x68] sm:$0xff]  ;;  %v371_v40 = vld [vmem:[%s1672_s22 + $0x60] sm:$0xff] }
  0x17   : > { %v396_v37 = vpack.c.bf16 %v370_v35, %v369_v34  ;;  %v372_v41 = vld [vmem:[%s1672_s22 + $0x68] sm:$0xff]  ;;  %v445_v42 = vpack.c.bf16 %v420_v39, %v419_v38  ;;  %v421_v47 = vld [vmem:[%s1666_s19 + $0x70] sm:$0xff]  ;;  %v422_v48 = vld [vmem:[%s1666_s19 + $0x78] sm:$0xff] }
  0x18   : > { %v397_v43 = vpack.c.bf16 %v372_v41, %v371_v40  ;;  %v373_v49 = vld [vmem:[%s1672_s22 + $0x70] sm:$0xff]  ;;  %v374_v50 = vld [vmem:[%s1672_s22 + $0x78] sm:$0xff]  ;;  %v446_v52 = vpack.c.bf16 %v422_v48, %v421_v47  ;;  %986 = vmatpush.bf16.msra.mxu2 %v1557_v51  ;;  %v423_v54 = vld [vmem:[%s1666_s19 + $0x80] sm:$0xff] }
  0x19   : > { %v398_v53 = vpack.c.bf16 %v374_v50, %v373_v49  ;;  %v424_v55 = vld [vmem:[%s1666_s19 + $0x88] sm:$0xff]  ;;  %v375_v56 = vld [vmem:[%s1672_s22 + $0x80] sm:$0xff]  ;;  %v425_v5 = vld [vmem:[%s1666_s19 + $0x90] sm:$0xff] }
  0x1a   : > { %v376_v57 = vld [vmem:[%s1672_s22 + $0x88] sm:$0xff]  ;;  %v447_v58 = vpack.c.bf16 %v424_v55, %v423_v54  ;;  %v1743_v63 = vld [vmem:[%s2010_s4] ss:$0 sm:$0xff]  ;;  %v426_v6 = vld [vmem:[%s1666_s19 + $0x98] sm:$0xff] }
  0x1b   : > { %v399_v60 = vpack.c.bf16 %v376_v57, %v375_v56  ;;  %v377_v7 = vld [vmem:[%s1672_s22 + $0x90] sm:$0xff]  ;;  %v378_v8 = vld [vmem:[%s1672_s22 + $0x98] sm:$0xff]  ;;  %v448_v11 = vpack.c.bf16 %v426_v6, %v425_v5  ;;  %v427_v22 = vld [vmem:[%s1666_s19 + $0xa0] sm:$0xff] }
  0x1c   : > { %v400_v14 = vpack.c.bf16 %v378_v8, %v377_v7  ;;  %v428_v23 = vld [vmem:[%s1666_s19 + $0xa8] sm:$0xff]  ;;  %v429_v39 = vld [vmem:[%s1666_s19 + $0xb0] sm:$0xff]  ;;  %v430_v40 = vld [vmem:[%s1666_s19 + $0xb8] sm:$0xff] }
  0x1d   : > { %v449_v28 = vpack.c.bf16 %v428_v23, %v427_v22  ;;  %v381_v41 = vld [vmem:[%s1672_s22 + $0xb0] sm:$0xff]  ;;  %v450_v45 = vpack.c.bf16 %v430_v40, %v429_v39  ;;  %v431_v56 = vld [vmem:[%s1666_s19 + $0xc0] sm:$0xff]  ;;  %v432_v57 = vld [vmem:[%s1666_s19 + $0xc8] sm:$0xff] }
  0x1e   : > { %v1567_v40 = vld [vmem:[%s2013_s7 + $0x30] sm:$0xff] }
  0x21   : > { %1454 = vmatmul.msk.bf16.gmra.mxu0 %vm465_vm0, %v440_v12 }
  0x22   : > { %1474 = vmatmul.msk.bf16.gmra.mxu1 %vm465_vm0, %v392_v13 }
  0x31   : > { %1455 = vmatmul.msk.bf16.gmra.mxu0 %vm465_vm0, %v441_v18 }
  0x32   : > { %1475 = vmatmul.msk.bf16.gmra.mxu1 %vm465_vm0, %v393_v19 }
  0x41   : > { %1456 = vmatmul.msk.bf16.gmra.mxu0 %vm465_vm0, %v442_v24  ;;  %v379_v24 = vld [vmem:[%s1672_s22 + $0xa0] sm:$0xff] }
  0x42   : > { %1476 = vmatmul.msk.bf16.gmra.mxu1 %vm465_vm0, %v394_v25  ;;  %v380_v25 = vld [vmem:[%s1672_s22 + $0xa8] sm:$0xff] }
  0x51   : > { %1457 = vmatmul.msk.bf16.gmra.mxu0 %vm465_vm0, %v443_v30 }
  0x52   : > { %1477 = vmatmul.msk.bf16.gmra.mxu1 %vm465_vm0, %v395_v31  ;;  %v401_v31 = vpack.c.bf16 %v380_v25, %v379_v24 }
  0x61   : > { %1458 = vmatmul.msk.bf16.gmra.mxu0 %vm465_vm0, %v444_v36 }
  0x62   : > { %1478 = vmatmul.msk.bf16.gmra.mxu1 %vm465_vm0, %v396_v37 }
  0x71   : > { %1459 = vmatmul.msk.bf16.gmra.mxu0 %vm465_vm0, %v445_v42  ;;  %v382_v42 = vld [vmem:[%s1672_s22 + $0xb8] sm:$0xff] }
  0x72   : > { %1479 = vmatmul.msk.bf16.gmra.mxu1 %vm465_vm0, %v397_v43  ;;  %v402_v48 = vpack.c.bf16 %v382_v42, %v381_v41 }
  0x81   : > { %1460 = vmatmul.msk.bf16.gmra.mxu0 %vm465_vm0, %v446_v52 }
  0x82   : > { %1480 = vmatmul.msk.bf16.gmra.mxu1 %vm465_vm0, %v398_v53 }
  0x8e   : > { %v523_v59 = vpop.f32.mrf.mxu0 }
  0x8f   : > { %v666_v61 = vpop.f32.mrf.mxu1 }
  0x90   : > { %v667_v62 = vadd.f32 %v666_v61, %v523_v59  ;;  %v384_v59 = vld [vmem:[%s1672_s22 + $0xc8] sm:$0xff] }
  0x91   : > { %1461 = vmatmul.msk.bf16.gmra.mxu0 %vm465_vm0, %v447_v58  ;;  %v383_v58 = vld [vmem:[%s1672_s22 + $0xc0] sm:$0xff] }
  0x92   : > { %1481 = vmatmul.msk.bf16.gmra.mxu1 %vm465_vm0, %v399_v60  ;;  %v750_v2 = vadd.f32 %v1743_v63, %v667_v62  ;;  %v451_v62 = vpack.c.bf16 %v432_v57, %v431_v56 }
  0x94   : > { %v846_v9 = vmax.f32 %v750_v2, 0.0  ;;  %v403_v2 = vpack.c.bf16 %v384_v59, %v383_v58  ;;  %v1564_v59 = vld [vmem:[%s2013_s7 + $0x18] sm:$0xff] }
  0x96   : > { %v525_v0 = vpop.f32.mrf.mxu0 }
  0x97   : > { %v668_v1 = vpop.f32.mrf.mxu1 }
  0x98   : > { %v669_v3 = vadd.f32 %v668_v1, %v525_v0 }
  0x9a   : > { %v751_v4 = vadd.f32 %v1743_v63, %v669_v3 }
  0x9c   : > { %v847_v10 = vmax.f32 %v751_v4, 0.0 }
  0x9e   : > { %v528_v12 = vpop.f32.mrf.mxu0  ;;  %v878_v13 = vpack.c.bf16 %v847_v10, %v846_v9  ;;  %v433_v10 = vld [vmem:[%s1666_s19 + $0xd0] sm:$0xff] }
  0x9f   : > { %v671_v15 = vpop.f32.mrf.mxu1 }
  0xa0   : > { %1505 = vmatmul.msk.bf16.vlgmr.msra.gmra.mxu2 %vm930_vm1, %v878_v13  ;;  %v672_v16 = vadd.f32 %v671_v15, %v528_v12  ;;  %v385_v12 = vld [vmem:[%s1672_s22 + $0xd0] sm:$0xff]  ;;  %v386_v13 = vld [vmem:[%s1672_s22 + $0xd8] sm:$0xff] }
  0xa1   : > { %1462 = vmatmul.msk.bf16.gmra.mxu0 %vm465_vm0, %v448_v11  ;;  %v434_v11 = vld [vmem:[%s1666_s19 + $0xd8] sm:$0xff] }
  0xa2   : > { %1482 = vmatmul.msk.bf16.gmra.mxu1 %vm465_vm0, %v400_v14  ;;  %v752_v19 = vadd.f32 %v1743_v63, %v672_v16  ;;  %v452_v16 = vpack.c.bf16 %v434_v11, %v433_v10 }
  0xa4   : > { %v848_v26 = vmax.f32 %v752_v19, 0.0  ;;  %v404_v19 = vpack.c.bf16 %v386_v13, %v385_v12 }
  0xa6   : > { %v530_v17 = vpop.f32.mrf.mxu0 }
  0xa7   : > { %v673_v18 = vpop.f32.mrf.mxu1 }
  0xa8   : > { %v674_v20 = vadd.f32 %v673_v18, %v530_v17 }
  0xaa   : > { %v753_v21 = vadd.f32 %v1743_v63, %v674_v20 }
  0xac   : > { %v849_v27 = vmax.f32 %v753_v21, 0.0 }
  0xae   : > { %v533_v29 = vpop.f32.mrf.mxu0  ;;  %v879_v30 = vpack.c.bf16 %v849_v27, %v848_v26  ;;  %v435_v27 = vld [vmem:[%s1666_s19 + $0xe0] sm:$0xff] }
  0xaf   : > { %v676_v32 = vpop.f32.mrf.mxu1 }
  0xb0   : > { %1506 = vmatmul.msk.bf16.gmra.mxu2 %vm930_vm1, %v879_v30  ;;  %v677_v33 = vadd.f32 %v676_v32, %v533_v29  ;;  %v387_v29 = vld [vmem:[%s1672_s22 + $0xe0] sm:$0xff]  ;;  %v388_v30 = vld [vmem:[%s1672_s22 + $0xe8] sm:$0xff] }
  0xb1   : > { %1463 = vmatmul.msk.bf16.gmra.mxu0 %vm465_vm0, %v449_v28  ;;  %v436_v28 = vld [vmem:[%s1666_s19 + $0xe8] sm:$0xff] }
  0xb2   : > { %1483 = vmatmul.msk.bf16.gmra.mxu1 %vm465_vm0, %v401_v31  ;;  %v754_v36 = vadd.f32 %v1743_v63, %v677_v33  ;;  %v453_v33 = vpack.c.bf16 %v436_v28, %v435_v27 }
  0xb4   : > { %v850_v43 = vmax.f32 %v754_v36, 0.0  ;;  %v405_v36 = vpack.c.bf16 %v388_v30, %v387_v29 }
  0xb6   : > { %v535_v34 = vpop.f32.mrf.mxu0 }
  0xb7   : > { %v678_v35 = vpop.f32.mrf.mxu1 }
  0xb8   : > { %v679_v37 = vadd.f32 %v678_v35, %v535_v34 }
  0xba   : > { %v755_v38 = vadd.f32 %v1743_v63, %v679_v37 }
  0xbc   : > { %v851_v44 = vmax.f32 %v755_v38, 0.0  ;;  %v1568_v38 = vld [vmem:[%s2013_s7 + $0x38] sm:$0xff] }
  0xbd   : > { %1248 = vmatpush.bf16.msrb.mxu0 %v1568_v38  ;;  %1569 = vmatpush.bf16.msra.mxu3 %v1568_v38 }
  0xbe   : > { %v538_v46 = vpop.f32.mrf.mxu0  ;;  %v880_v47 = vpack.c.bf16 %v851_v44, %v850_v43 }
  0xbf   : > { %v681_v49 = vpop.f32.mrf.mxu1 }
  0xc0   : > { %1507 = vmatmul.msk.bf16.gmra.mxu2 %vm930_vm1, %v880_v47  ;;  %v682_v50 = vadd.f32 %v681_v49, %v538_v46  ;;  %v437_v47 = vld [vmem:[%s1666_s19 + $0xf0] sm:$0xff] }
  0xc1   : > { %1464 = vmatmul.msk.bf16.gmra.mxu0 %vm465_vm0, %v450_v45  ;;  %1570 = vmatpush.bf16.msra.mxu3 %v1567_v40  ;;  %v1566_v45 = vld [vmem:[%s2013_s7 + $0x28] sm:$0xff]  ;;  %v389_v49 = vld [vmem:[%s1672_s22 + $0xf0] sm:$0xff] }
  0xc2   : > { %1484 = vmatmul.msk.bf16.gmra.mxu1 %vm465_vm0, %v402_v48  ;;  %v756_v53 = vadd.f32 %v1743_v63, %v682_v50  ;;  %1249 = vmatpush.bf16.msrb.mxu0 %v1567_v40  ;;  %v438_v48 = vld [vmem:[%s1666_s19 + $0xf8] sm:$0xff] }
  0xc3   : > { %v390_v50 = vld [vmem:[%s1672_s22 + $0xf8] sm:$0xff] }
  0xc4   : > { %v852_v60 = vmax.f32 %v756_v53, 0.0  ;;  %v454_v53 = vpack.c.bf16 %v438_v48, %v437_v47  ;;  %v406_v57 = vpack.c.bf16 %v390_v50, %v389_v49 }
  0xc5   : > { %1571 = vmatpush.bf16.msra.mxu3 %v1566_v45 }
  0xc6   : > { %v540_v51 = vpop.f32.mrf.mxu0  ;;  %1250 = vmatpush.bf16.msrb.mxu0 %v1566_v45 }
  0xc7   : > { %v683_v52 = vpop.f32.mrf.mxu1 }
  0xc8   : > { %v684_v54 = vadd.f32 %v683_v52, %v540_v51 }
  0xca   : > { %v757_v55 = vadd.f32 %v1743_v63, %v684_v54  ;;  %v1565_v54 = vld [vmem:[%s2013_s7 + $0x20] sm:$0xff] }
  0xcb   : > { %1251 = vmatpush.bf16.msrb.mxu0 %v1565_v54  ;;  %1572 = vmatpush.bf16.msra.mxu3 %v1565_v54 }
  0xcc   : > { %v853_v61 = vmax.f32 %v757_v55, 0.0 }
  0xce   : > { %v543_v0 = vpop.f32.mrf.mxu0  ;;  %v881_v1 = vpack.c.bf16 %v853_v61, %v852_v60  ;;  %v1563_v61 = vld [vmem:[%s2013_s7 + $0x10] sm:$0xff] }
  0xcf   : > { %v686_v3 = vpop.f32.mrf.mxu1  ;;  %1252 = vmatpush.bf16.msrb.mxu0 %v1564_v59  ;;  %1573 = vmatpush.bf16.msra.mxu3 %v1564_v59 }
  0xd0   : > { %1508 = vmatmul.msk.bf16.gmra.mxu2 %vm930_vm1, %v881_v1  ;;  %v687_v4 = vadd.f32 %v686_v3, %v543_v0  ;;  %v1562_v3 = vld [vmem:[%s2013_s7 + $0x8] sm:$0xff] }
  0xd1   : > { %1465 = vmatmul.msk.bf16.gmra.mxu0 %vm465_vm0, %v451_v62 }
  0xd2   : > { %1485 = vmatmul.msk.bf16.gmra.mxu1 %vm465_vm0, %v403_v2  ;;  %v758_v7 = vadd.f32 %v1743_v63, %v687_v4 }
  0xd3   : > { %1253 = vmatpush.bf16.msrb.mxu0 %v1563_v61  ;;  %1574 = vmatpush.bf16.msra.mxu3 %v1563_v61 }
  0xd4   : > { %v854_v14 = vmax.f32 %v758_v7, 0.0  ;;  %v1561_v7 = vld [vmem:[%s2013_s7] sm:$0xff] }
  0xd6   : > { %v545_v5 = vpop.f32.mrf.mxu0 }
  0xd7   : > { %v688_v6 = vpop.f32.mrf.mxu1  ;;  %1254 = vmatpush.bf16.msrb.mxu0 %v1562_v3  ;;  %1575 = vmatpush.bf16.msra.mxu3 %v1562_v3 }
  0xd8   : > { %v689_v8 = vadd.f32 %v688_v6, %v545_v5 }
  0xda   : > { %v759_v9 = vadd.f32 %v1743_v63, %v689_v8 }
  0xdb   : > { %1255 = vmatpush.bf16.msrb.mxu0 %v1561_v7  ;;  %1576 = vmatpush.bf16.msra.mxu3 %v1561_v7 }
  0xdc   : > { %v855_v15 = vmax.f32 %v759_v9, 0.0 }
  0xde   : > { %v548_v17 = vpop.f32.mrf.mxu0  ;;  %v882_v18 = vpack.c.bf16 %v855_v15, %v854_v14 }
  0xdf   : > { %v691_v20 = vpop.f32.mrf.mxu1 }
  0xe0   : > { %1509 = vmatmul.msk.bf16.gmra.mxu2 %vm930_vm1, %v882_v18  ;;  %v692_v21 = vadd.f32 %v691_v20, %v548_v17 }
  0xe1   : > { %1466 = vmatmul.msk.bf16.gmra.mxu0 %vm465_vm0, %v452_v16 }
  0xe2   : > { %1486 = vmatmul.msk.bf16.gmra.mxu1 %vm465_vm0, %v404_v19  ;;  %v760_v24 = vadd.f32 %v1743_v63, %v692_v21 }
  0xe4   : > { %v856_v31 = vmax.f32 %v760_v24, 0.0  ;;  %v1841_v24 = vld [vmem:[%s2012_s6] ss:$0 sm:$0xff] }
  0xe6   : > { %v550_v22 = vpop.f32.mrf.mxu0 }
  0xe7   : > { %v693_v23 = vpop.f32.mrf.mxu1 }
  0xe8   : > { %v694_v25 = vadd.f32 %v693_v23, %v550_v22 }
  0xea   : > { %v761_v26 = vadd.f32 %v1743_v63, %v694_v25 }
  0xec   : > { %v857_v32 = vmax.f32 %v761_v26, 0.0 }
  0xee   : > { %v553_v34 = vpop.f32.mrf.mxu0  ;;  %v883_v35 = vpack.c.bf16 %v857_v32, %v856_v31 }
  0xef   : > { %v696_v37 = vpop.f32.mrf.mxu1 }
  0xf0   : > { %1510 = vmatmul.msk.bf16.gmra.mxu2 %vm930_vm1, %v883_v35  ;;  %v697_v39 = vadd.f32 %v696_v37, %v553_v34 }
  0xf1   : > { %1467 = vmatmul.msk.bf16.gmra.mxu0 %vm465_vm0, %v453_v33 }
  0xf2   : > { %1487 = vmatmul.msk.bf16.gmra.mxu1 %vm465_vm0, %v405_v36  ;;  %v762_v43 = vadd.f32 %v1743_v63, %v697_v39 }
  0xf4   : > { %v858_v51 = vmax.f32 %v762_v43, 0.0 }
  0xf6   : > { %v555_v41 = vpop.f32.mrf.mxu0 }
  0xf7   : > { %v698_v42 = vpop.f32.mrf.mxu1 }
  0xf8   : > { %v699_v44 = vadd.f32 %v698_v42, %v555_v41 }
  0xfa   : > { %v763_v46 = vadd.f32 %v1743_v63, %v699_v44 }
  0xfc   : > { %v859_v52 = vmax.f32 %v763_v46, 0.0 }
  0xfe   : > { %v558_v55 = vpop.f32.mrf.mxu0  ;;  %v884_v56 = vpack.c.bf16 %v859_v52, %v858_v51 }
  0xff   : > { %v701_v58 = vpop.f32.mrf.mxu1 }
 0x100   : > { %1511 = vmatmul.msk.bf16.gmra.mxu2 %vm930_vm1, %v884_v56  ;;  %v702_v60 = vadd.f32 %v701_v58, %v558_v55 }
 0x101   : > { %1468 = vmatmul.msk.bf16.gmra.mxu0 %vm465_vm0, %v454_v53 }
 0x102   : > { %1488 = vmatmul.msk.bf16.gmra.mxu1 %vm465_vm0, %v406_v57  ;;  %v764_v1 = vadd.f32 %v1743_v63, %v702_v60 }
 0x104   : > { %v860_v5 = vmax.f32 %v764_v1, 0.0 }
 0x106   : > { %v560_v62 = vpop.f32.mrf.mxu0 }
 0x107   : > { %v703_v0 = vpop.f32.mrf.mxu1 }
 0x108   : > { %v704_v2 = vadd.f32 %v703_v0, %v560_v62 }
 0x10a   : > { %v765_v4 = vadd.f32 %v1743_v63, %v704_v2 }
 0x10c   : > { %v861_v6 = vmax.f32 %v765_v4, 0.0 }
 0x10e   : > { %v563_v8 = vpop.f32.mrf.mxu0  ;;  %v885_v9 = vpack.c.bf16 %v861_v6, %v860_v5 }
 0x10f   : > { %v706_v10 = vpop.f32.mrf.mxu1 }
 0x110   : > { %1512 = vmatmul.msk.bf16.gmra.mxu2 %vm930_vm1, %v885_v9  ;;  %v707_v11 = vadd.f32 %v706_v10, %v563_v8 }
 0x112   : > { %v766_v14 = vadd.f32 %v1743_v63, %v707_v11 }
 0x114   : > { %v862_v17 = vmax.f32 %v766_v14, 0.0 }
 0x116   : > { %v565_v12 = vpop.f32.mrf.mxu0 }
 0x117   : > { %v708_v13 = vpop.f32.mrf.mxu1 }
 0x118   : > { %v709_v15 = vadd.f32 %v708_v13, %v565_v12 }
 0x11a   : > { %v767_v16 = vadd.f32 %v1743_v63, %v709_v15 }
 0x11c   : > { %v863_v18 = vmax.f32 %v767_v16, 0.0 }
 0x11e   : > { %v568_v19 = vpop.f32.mrf.mxu0  ;;  %v886_v20 = vpack.c.bf16 %v863_v18, %v862_v17 }
 0x11f   : > { %v711_v21 = vpop.f32.mrf.mxu1 }
 0x120   : > { %1513 = vmatmul.msk.bf16.gmra.mxu2 %vm930_vm1, %v886_v20  ;;  %v712_v23 = vadd.f32 %v711_v21, %v568_v19 }
 0x122   : > { %v768_v27 = vadd.f32 %v1743_v63, %v712_v23 }
 0x123   : > { %v988_v22 = vpop.f32.mrf.mxu2 }
 0x124   : > { %v989_v29 = vadd.f32 %v1841_v24, %v988_v22  ;;  %v864_v32 = vmax.f32 %v768_v27, 0.0 }
 0x126   : > { %v570_v25 = vpop.f32.mrf.mxu0  ;;  %v1132_v35 = vmax.f32 %v989_v29, 0.0 }
 0x127   : > { %v713_v26 = vpop.f32.mrf.mxu1 }
 0x128   : > { %v714_v28 = vadd.f32 %v713_v26, %v570_v25 }
 0x12a   : > { %v769_v30 = vadd.f32 %v1743_v63, %v714_v28 }
 0x12b   : > { %v990_v31 = vpop.f32.mrf.mxu2 }
 0x12c   : > { %v865_v33 = vmax.f32 %v769_v30, 0.0  ;;  %v991_v34 = vadd.f32 %v1841_v24, %v990_v31 }
 0x12e   : > { %v1133_v36 = vmax.f32 %v991_v34, 0.0  ;;  %v573_v37 = vpop.f32.mrf.mxu0  ;;  %v887_v38 = vpack.c.bf16 %v865_v33, %v864_v32 }
 0x12f   : > { %v716_v39 = vpop.f32.mrf.mxu1 }
 0x130   : > { %v1164_v40 = vpack.c.bf16 %v1133_v36, %v1132_v35  ;;  %1514 = vmatmul.msk.bf16.gmra.mxu2 %vm930_vm1, %v887_v38  ;;  %v717_v42 = vadd.f32 %v716_v39, %v573_v37 }
 0x132   : > { %1256 = vmatmul.bf16.vlgmr.msrb.gmra.mxu0 %v1164_v40  ;;  %v770_v45 = vadd.f32 %v1743_v63, %v717_v42 }
 0x133   : > { %v993_v41 = vpop.f32.mrf.mxu2 }
 0x134   : > { %v994_v47 = vadd.f32 %v1841_v24, %v993_v41  ;;  %v866_v50 = vmax.f32 %v770_v45, 0.0 }
 0x136   : > { %v575_v43 = vpop.f32.mrf.mxu0  ;;  %v1134_v53 = vmax.f32 %v994_v47, 0.0 }
 0x137   : > { %v718_v44 = vpop.f32.mrf.mxu1 }
 0x138   : > { %v719_v46 = vadd.f32 %v718_v44, %v575_v43 }
 0x13a   : > { %v771_v48 = vadd.f32 %v1743_v63, %v719_v46 }
 0x13b   : > { %v995_v49 = vpop.f32.mrf.mxu2 }
 0x13c   : > { %v867_v51 = vmax.f32 %v771_v48, 0.0  ;;  %v996_v52 = vadd.f32 %v1841_v24, %v995_v49 }
 0x13e   : > { %v1135_v54 = vmax.f32 %v996_v52, 0.0  ;;  %v578_v55 = vpop.f32.mrf.mxu0  ;;  %v888_v56 = vpack.c.bf16 %v867_v51, %v866_v50 }
 0x13f   : > { %v721_v57 = vpop.f32.mrf.mxu1 }
 0x140   : > { %1515 = vmatmul.msk.bf16.gmra.mxu2 %vm930_vm1, %v888_v56  ;;  %v1165_v58 = vpack.c.bf16 %v1135_v54, %v1134_v53  ;;  %v722_v60 = vadd.f32 %v721_v57, %v578_v55 }
 0x142   : > { %1261 = vmatmul.bf16.vlgmr.msra.gmra.mxu3 %v1165_v58  ;;  %v772_v0 = vadd.f32 %v1743_v63, %v722_v60 }
 0x143   : > { %v998_v59 = vpop.f32.mrf.mxu2 }
 0x144   : > { %v999_v2 = vadd.f32 %v1841_v24, %v998_v59  ;;  %v868_v5 = vmax.f32 %v772_v0, 0.0 }
 0x146   : > { %v580_v61 = vpop.f32.mrf.mxu0  ;;  %v1136_v8 = vmax.f32 %v999_v2, 0.0 }
 0x147   : > { %v723_v62 = vpop.f32.mrf.mxu1 }
 0x148   : > { %v724_v1 = vadd.f32 %v723_v62, %v580_v61 }
 0x14a   : > { %v773_v3 = vadd.f32 %v1743_v63, %v724_v1 }
 0x14b   : > { %v1000_v4 = vpop.f32.mrf.mxu2 }
 0x14c   : > { %v869_v6 = vmax.f32 %v773_v3, 0.0  ;;  %v1001_v7 = vadd.f32 %v1841_v24, %v1000_v4 }
 0x14e   : > { %v1137_v9 = vmax.f32 %v1001_v7, 0.0  ;;  %v583_v10 = vpop.f32.mrf.mxu0  ;;  %v889_v11 = vpack.c.bf16 %v869_v6, %v868_v5 }
 0x14f   : > { %v726_v12 = vpop.f32.mrf.mxu1 }
 0x150   : > { %1516 = vmatmul.msk.bf16.gmra.mxu2 %vm930_vm1, %v889_v11  ;;  %v1166_v13 = vpack.c.bf16 %v1137_v9, %v1136_v8  ;;  %v727_v15 = vadd.f32 %v726_v12, %v583_v10 }
 0x152   : > { %1266 = vmatmul.bf16.gmra.mxu3 %v1166_v13  ;;  %v774_v18 = vadd.f32 %v1743_v63, %v727_v15 }
 0x153   : > { %v1003_v14 = vpop.f32.mrf.mxu2 }
 0x154   : > { %v1004_v20 = vadd.f32 %v1841_v24, %v1003_v14  ;;  %v870_v23 = vmax.f32 %v774_v18, 0.0 }
 0x156   : > { %v585_v16 = vpop.f32.mrf.mxu0  ;;  %v1138_v27 = vmax.f32 %v1004_v20, 0.0 }
 0x157   : > { %v728_v17 = vpop.f32.mrf.mxu1 }
 0x158   : > { %v729_v19 = vadd.f32 %v728_v17, %v585_v16 }
 0x15a   : > { %v775_v21 = vadd.f32 %v1743_v63, %v729_v19 }
 0x15b   : > { %v1005_v22 = vpop.f32.mrf.mxu2 }
 0x15c   : > { %v871_v25 = vmax.f32 %v775_v21, 0.0  ;;  %v1006_v26 = vadd.f32 %v1841_v24, %v1005_v22 }
 0x15e   : > { %v890_v28 = vpack.c.bf16 %v871_v25, %v870_v23  ;;  %v1139_v29 = vmax.f32 %v1006_v26, 0.0  ;;  %v588_v30 = vpop.f32.mrf.mxu0 }
 0x15f   : > { %v731_v31 = vpop.f32.mrf.mxu1 }
 0x160   : > { %1517 = vmatmul.msk.bf16.gmra.mxu2 %vm930_vm1, %v890_v28  ;;  %v1167_v32 = vpack.c.bf16 %v1139_v29, %v1138_v27  ;;  %v732_v34 = vadd.f32 %v731_v31, %v588_v30 }
 0x162   : > { %1271 = vmatmul.bf16.gmra.mxu3 %v1167_v32  ;;  %v776_v37 = vadd.f32 %v1743_v63, %v732_v34 }
 0x163   : > { %v1008_v33 = vpop.f32.mrf.mxu2 }
 0x164   : > { %v1009_v39 = vadd.f32 %v1841_v24, %v1008_v33  ;;  %v872_v42 = vmax.f32 %v776_v37, 0.0  ;;  %v1885_v33 = vld [vmem:[%s2014_s8] ss:$0 sm:$0xff] }
 0x166   : > { %v590_v35 = vpop.f32.mrf.mxu0  ;;  %v1140_v45 = vmax.f32 %v1009_v39, 0.0 }
 0x167   : > { %v733_v36 = vpop.f32.mrf.mxu1 }
 0x168   : > { %v734_v38 = vadd.f32 %v733_v36, %v590_v35 }
 0x16a   : > { %v777_v40 = vadd.f32 %v1743_v63, %v734_v38 }
 0x16b   : > { %v1010_v41 = vpop.f32.mrf.mxu2 }
 0x16c   : > { %v873_v43 = vmax.f32 %v777_v40, 0.0  ;;  %v1011_v44 = vadd.f32 %v1841_v24, %v1010_v41 }
 0x16e   : > { %v891_v46 = vpack.c.bf16 %v873_v43, %v872_v42  ;;  %v1141_v47 = vmax.f32 %v1011_v44, 0.0  ;;  %v593_v48 = vpop.f32.mrf.mxu0 }
 0x16f   : > { %v736_v49 = vpop.f32.mrf.mxu1 }
 0x170   : > { %1518 = vmatmul.msk.bf16.gmra.mxu2 %vm930_vm1, %v891_v46  ;;  %v1168_v50 = vpack.c.bf16 %v1141_v47, %v1140_v45  ;;  %v737_v52 = vadd.f32 %v736_v49, %v593_v48 }
 0x172   : > { %1276 = vmatmul.bf16.gmra.mxu3 %v1168_v50  ;;  %v778_v55 = vadd.f32 %v1743_v63, %v737_v52 }
 0x173   : > { %v1013_v51 = vpop.f32.mrf.mxu2 }
 0x174   : > { %v1014_v57 = vadd.f32 %v1841_v24, %v1013_v51  ;;  %v874_v60 = vmax.f32 %v778_v55, 0.0 }
 0x176   : > { %v595_v53 = vpop.f32.mrf.mxu0  ;;  %v1142_v0 = vmax.f32 %v1014_v57, 0.0 }
 0x177   : > { %v738_v54 = vpop.f32.mrf.mxu1 }
 0x178   : > { %v739_v56 = vadd.f32 %v738_v54, %v595_v53 }
 0x17a   : > { %v779_v58 = vadd.f32 %v1743_v63, %v739_v56 }
 0x17b   : > { %v1015_v59 = vpop.f32.mrf.mxu2 }
 0x17c   : > { %v875_v61 = vmax.f32 %v779_v58, 0.0  ;;  %v1016_v62 = vadd.f32 %v1841_v24, %v1015_v59 }
 0x17e   : > { %v892_v1 = vpack.c.bf16 %v875_v61, %v874_v60  ;;  %v1143_v2 = vmax.f32 %v1016_v62, 0.0  ;;  %v598_v3 = vpop.f32.mrf.mxu0 }
 0x17f   : > { %v741_v4 = vpop.f32.mrf.mxu1 }
 0x180   : > { %1519 = vmatmul.msk.bf16.gmra.mxu2 %vm930_vm1, %v892_v1  ;;  %v1169_v5 = vpack.c.bf16 %v1143_v2, %v1142_v0  ;;  %v742_v7 = vadd.f32 %v741_v4, %v598_v3 }
 0x182   : > { %1281 = vmatmul.bf16.gmra.mxu3 %v1169_v5  ;;  %v780_v10 = vadd.f32 %v1743_v63, %v742_v7 }
 0x183   : > { %v1018_v6 = vpop.f32.mrf.mxu2 }
 0x184   : > { %v1019_v12 = vadd.f32 %v1841_v24, %v1018_v6  ;;  %v876_v15 = vmax.f32 %v780_v10, 0.0 }
 0x186   : > { %v600_v8 = vpop.f32.mrf.mxu0  ;;  %v1144_v18 = vmax.f32 %v1019_v12, 0.0 }
 0x187   : > { %v743_v9 = vpop.f32.mrf.mxu1 }
 0x188   : > { %v744_v11 = vadd.f32 %v743_v9, %v600_v8 }
 0x18a   : > { %v781_v13 = vadd.f32 %v1743_v63, %v744_v11 }
 0x18b   : > { %v1020_v14 = vpop.f32.mrf.mxu2 }
 0x18c   : > { %v877_v16 = vmax.f32 %v781_v13, 0.0  ;;  %v1021_v17 = vadd.f32 %v1841_v24, %v1020_v14 }
 0x18e   : > { %v893_v19 = vpack.c.bf16 %v877_v16, %v876_v15  ;;  %v1145_v20 = vmax.f32 %v1021_v17, 0.0 }
 0x190   : > { %1520 = vmatmul.msk.bf16.gmra.mxu2 %vm930_vm1, %v893_v19  ;;  %v1170_v21 = vpack.c.bf16 %v1145_v20, %v1144_v18 }
 0x192   : > { %1286 = vmatmul.bf16.gmra.mxu3 %v1170_v21 }
 0x193   : > { %v1023_v22 = vpop.f32.mrf.mxu2 }
 0x194   : > { %v1024_v23 = vadd.f32 %v1841_v24, %v1023_v22 }
 0x196   : > { %v1146_v63 = vmax.f32 %v1024_v23, 0.0 }
 0x19b   : > { %v1025_v25 = vpop.f32.mrf.mxu2 }
 0x19c   : > { %v1026_v26 = vadd.f32 %v1841_v24, %v1025_v25 }
 0x19e   : > { %v1147_v27 = vmax.f32 %v1026_v26, 0.0 }
 0x1a0   : > { %v1171_v28 = vpack.c.bf16 %v1147_v27, %v1146_v63 }
 0x1a2   : > { %1291 = vmatmul.bf16.gmra.mxu3 %v1171_v28 }
 0x1a3   : > { %v1028_v29 = vpop.f32.mrf.mxu2 }
 0x1a4   : > { %v1029_v30 = vadd.f32 %v1841_v24, %v1028_v29 }
 0x1a6   : > { %v1148_v34 = vmax.f32 %v1029_v30, 0.0 }
 0x1ab   : > { %v1030_v31 = vpop.f32.mrf.mxu2 }
 0x1ac   : > { %v1031_v32 = vadd.f32 %v1841_v24, %v1030_v31 }
 0x1ae   : > { %v1149_v35 = vmax.f32 %v1031_v32, 0.0 }
 0x1af   : > { %v1257_v36 = vpop.f32.mrf.mxu0 }
 0x1b0   : > { %v1258_v37 = vadd.f32 %v1885_v33, %v1257_v36  ;;  %v1172_v38 = vpack.c.bf16 %v1149_v35, %v1148_v34 }
 0x1b2   : > { %1338 = vst.msk [vmem:[%s1891_s17] sm:$0xff] %vm1337_vm2, %v1258_v37  ;;  %1296 = vmatmul.bf16.gmra.mxu3 %v1172_v38 }
 0x1b3   : > { %v1033_v39 = vpop.f32.mrf.mxu2 }
 0x1b4   : > { %v1034_v42 = vadd.f32 %v1841_v24, %v1033_v39 }
 0x1b6   : > { %v1150_v45 = vmax.f32 %v1034_v42, 0.0 }
 0x1b7   : > { %v1259_v40 = vpop.f32.mrf.mxu0 }
 0x1b8   : > { %v1260_v41 = vadd.f32 %v1885_v33, %v1259_v40 }
 0x1ba   : > { %1339 = vst.msk [vmem:[%s1891_s17 + $0x8] sm:$0xff] %vm1337_vm2, %v1260_v41 }
 0x1bb   : > { %v1035_v43 = vpop.f32.mrf.mxu2 }
 0x1bc   : > { %v1036_v44 = vadd.f32 %v1841_v24, %v1035_v43 }
 0x1be   : > { %v1151_v46 = vmax.f32 %v1036_v44, 0.0 }
 0x1c0   : > { %v1173_v47 = vpack.c.bf16 %v1151_v46, %v1150_v45 }
 0x1c2   : > { %1301 = vmatmul.bf16.gmra.mxu3 %v1173_v47 }
 0x1c3   : > { %v1038_v48 = vpop.f32.mrf.mxu2 }
 0x1c4   : > { %v1039_v51 = vadd.f32 %v1841_v24, %v1038_v48 }
 0x1c5   : > { %v1262_v49 = vpop.f32.mrf.mxu3 }
 0x1c6   : > { %v1263_v50 = vadd.f32 %v1885_v33, %v1262_v49  ;;  %v1152_v55 = vmax.f32 %v1039_v51, 0.0 }
 0x1c8   : > { %1340 = vst.msk [vmem:[%s1891_s17 + $0x10] sm:$0xff] %vm1337_vm2, %v1263_v50 }
 0x1cb   : > { %v1040_v52 = vpop.f32.mrf.mxu2 }
 0x1cc   : > { %v1041_v53 = vadd.f32 %v1841_v24, %v1040_v52 }
 0x1cd   : > { %v1264_v54 = vpop.f32.mrf.mxu3 }
 0x1ce   : > { %v1153_v56 = vmax.f32 %v1041_v53, 0.0  ;;  %v1265_v57 = vadd.f32 %v1885_v33, %v1264_v54 }
 0x1d0   : > { %1341 = vst.msk [vmem:[%s1891_s17 + $0x18] sm:$0xff] %vm1337_vm2, %v1265_v57  ;;  %v1174_v58 = vpack.c.bf16 %v1153_v56, %v1152_v55 }
 0x1d2   : > { %1306 = vmatmul.bf16.gmra.mxu3 %v1174_v58 }
 0x1d3   : > { %v1043_v59 = vpop.f32.mrf.mxu2 }
 0x1d4   : > { %v1044_v62 = vadd.f32 %v1841_v24, %v1043_v59 }
 0x1d5   : > { %v1267_v60 = vpop.f32.mrf.mxu3 }
 0x1d6   : > { %v1268_v61 = vadd.f32 %v1885_v33, %v1267_v60  ;;  %v1154_v3 = vmax.f32 %v1044_v62, 0.0 }
 0x1d8   : > { %1342 = vst.msk [vmem:[%s1891_s17 + $0x20] sm:$0xff] %vm1337_vm2, %v1268_v61 }
 0x1db   : > { %v1045_v0 = vpop.f32.mrf.mxu2 }
 0x1dc   : > { %v1046_v1 = vadd.f32 %v1841_v24, %v1045_v0 }
 0x1dd   : > { %v1269_v2 = vpop.f32.mrf.mxu3 }
 0x1de   : > { %v1155_v4 = vmax.f32 %v1046_v1, 0.0  ;;  %v1270_v5 = vadd.f32 %v1885_v33, %v1269_v2 }
 0x1e0   : > { %1343 = vst.msk [vmem:[%s1891_s17 + $0x28] sm:$0xff] %vm1337_vm2, %v1270_v5  ;;  %v1175_v6 = vpack.c.bf16 %v1155_v4, %v1154_v3 }
 0x1e2   : > { %1311 = vmatmul.bf16.gmra.mxu3 %v1175_v6 }
 0x1e3   : > { %v1048_v7 = vpop.f32.mrf.mxu2 }
 0x1e4   : > { %v1049_v10 = vadd.f32 %v1841_v24, %v1048_v7 }
 0x1e5   : > { %v1272_v8 = vpop.f32.mrf.mxu3 }
 0x1e6   : > { %v1273_v9 = vadd.f32 %v1885_v33, %v1272_v8  ;;  %v1156_v14 = vmax.f32 %v1049_v10, 0.0 }
 0x1e8   : > { %1344 = vst.msk [vmem:[%s1891_s17 + $0x30] sm:$0xff] %vm1337_vm2, %v1273_v9 }
 0x1eb   : > { %v1050_v11 = vpop.f32.mrf.mxu2 }
 0x1ec   : > { %v1051_v12 = vadd.f32 %v1841_v24, %v1050_v11 }
 0x1ed   : > { %v1274_v13 = vpop.f32.mrf.mxu3 }
 0x1ee   : > { %v1157_v15 = vmax.f32 %v1051_v12, 0.0  ;;  %v1275_v16 = vadd.f32 %v1885_v33, %v1274_v13 }
 0x1f0   : > { %1345 = vst.msk [vmem:[%s1891_s17 + $0x38] sm:$0xff] %vm1337_vm2, %v1275_v16  ;;  %v1176_v17 = vpack.c.bf16 %v1157_v15, %v1156_v14 }
 0x1f2   : > { %1316 = vmatmul.bf16.gmra.mxu3 %v1176_v17 }
 0x1f3   : > { %v1053_v18 = vpop.f32.mrf.mxu2 }
 0x1f4   : > { %v1054_v21 = vadd.f32 %v1841_v24, %v1053_v18 }
 0x1f5   : > { %v1277_v19 = vpop.f32.mrf.mxu3 }
 0x1f6   : > { %v1278_v20 = vadd.f32 %v1885_v33, %v1277_v19  ;;  %v1158_v26 = vmax.f32 %v1054_v21, 0.0 }
 0x1f8   : > { %1346 = vst.msk [vmem:[%s1891_s17 + $0x40] sm:$0xff] %vm1337_vm2, %v1278_v20 }
 0x1fb   : > { %v1055_v22 = vpop.f32.mrf.mxu2 }
 0x1fc   : > { %v1056_v23 = vadd.f32 %v1841_v24, %v1055_v22 }
 0x1fd   : > { %v1279_v25 = vpop.f32.mrf.mxu3 }
 0x1fe   : > { %v1159_v63 = vmax.f32 %v1056_v23, 0.0  ;;  %v1280_v27 = vadd.f32 %v1885_v33, %v1279_v25 }
 0x200   : > { %v1177_v28 = vpack.c.bf16 %v1159_v63, %v1158_v26  ;;  %1347 = vst.msk [vmem:[%s1891_s17 + $0x48] sm:$0xff] %vm1337_vm2, %v1280_v27 }
 0x202   : > { %1321 = vmatmul.bf16.gmra.mxu3 %v1177_v28 }
 0x203   : > { %v1058_v29 = vpop.f32.mrf.mxu2 }
 0x204   : > { %v1059_v32 = vadd.f32 %v1841_v24, %v1058_v29 }
 0x205   : > { %v1282_v30 = vpop.f32.mrf.mxu3 }
 0x206   : > { %v1283_v31 = vadd.f32 %v1885_v33, %v1282_v30  ;;  %v1160_v37 = vmax.f32 %v1059_v32, 0.0 }
 0x208   : > { %1348 = vst.msk [vmem:[%s1891_s17 + $0x50] sm:$0xff] %vm1337_vm2, %v1283_v31 }
 0x20b   : > { %v1060_v34 = vpop.f32.mrf.mxu2 }
 0x20c   : > { %v1061_v35 = vadd.f32 %v1841_v24, %v1060_v34 }
 0x20d   : > { %v1284_v36 = vpop.f32.mrf.mxu3 }
 0x20e   : > { %v1161_v38 = vmax.f32 %v1061_v35, 0.0  ;;  %v1285_v39 = vadd.f32 %v1885_v33, %v1284_v36 }
 0x210   : > { %v1178_v40 = vpack.c.bf16 %v1161_v38, %v1160_v37  ;;  %1349 = vst.msk [vmem:[%s1891_s17 + $0x58] sm:$0xff] %vm1337_vm2, %v1285_v39 }
 0x212   : > { %1326 = vmatmul.bf16.gmra.mxu3 %v1178_v40 }
 0x213   : > { %v1063_v41 = vpop.f32.mrf.mxu2 }
 0x214   : > { %v1064_v44 = vadd.f32 %v1841_v24, %v1063_v41 }
 0x215   : > { %v1287_v42 = vpop.f32.mrf.mxu3 }
 0x216   : > { %v1288_v43 = vadd.f32 %v1885_v33, %v1287_v42  ;;  %v1162_v48 = vmax.f32 %v1064_v44, 0.0 }
 0x218   : > { %1350 = vst.msk [vmem:[%s1891_s17 + $0x60] sm:$0xff] %vm1337_vm2, %v1288_v43 }
 0x21b   : > { %v1065_v45 = vpop.f32.mrf.mxu2 }
 0x21c   : > { %v1066_v46 = vadd.f32 %v1841_v24, %v1065_v45 }
 0x21d   : > { %v1289_v47 = vpop.f32.mrf.mxu3 }
 0x21e   : > { %v1163_v49 = vmax.f32 %v1066_v46, 0.0  ;;  %v1290_v50 = vadd.f32 %v1885_v33, %v1289_v47 }
 0x220   : > { %v1179_v51 = vpack.c.bf16 %v1163_v49, %v1162_v48  ;;  %1351 = vst.msk [vmem:[%s1891_s17 + $0x68] sm:$0xff] %vm1337_vm2, %v1290_v50 }
 0x222   : > { %1331 = vmatmul.bf16.gmra.mxu3 %v1179_v51 }
 0x225   : > { %v1292_v52 = vpop.f32.mrf.mxu3 }
 0x226   : > { %v1293_v53 = vadd.f32 %v1885_v33, %v1292_v52 }
 0x228   : > { %1352 = vst.msk [vmem:[%s1891_s17 + $0x70] sm:$0xff] %vm1337_vm2, %v1293_v53 }
 0x22d   : > { %v1294_v54 = vpop.f32.mrf.mxu3 }
 0x22e   : > { %v1295_v24 = vadd.f32 %v1885_v33, %v1294_v54 }
 0x230   : > { %1353 = vst.msk [vmem:[%s1891_s17 + $0x78] sm:$0xff] %vm1337_vm2, %v1295_v24 }
 0x235   : > { %v1297_v55 = vpop.f32.mrf.mxu3 }
 0x236   : > { %v1298_v56 = vadd.f32 %v1885_v33, %v1297_v55 }
 0x238   : > { %1354 = vst.msk [vmem:[%s1891_s17 + $0x80] sm:$0xff] %vm1337_vm2, %v1298_v56 }
 0x23d   : > { %v1299_v57 = vpop.f32.mrf.mxu3 }
 0x23e   : > { %v1300_v58 = vadd.f32 %v1885_v33, %v1299_v57 }
 0x240   : > { %1355 = vst.msk [vmem:[%s1891_s17 + $0x88] sm:$0xff] %vm1337_vm2, %v1300_v58 }
 0x245   : > { %v1302_v59 = vpop.f32.mrf.mxu3 }
 0x246   : > { %v1303_v60 = vadd.f32 %v1885_v33, %v1302_v59 }
 0x248   : > { %1356 = vst.msk [vmem:[%s1891_s17 + $0x90] sm:$0xff] %vm1337_vm2, %v1303_v60 }
 0x24d   : > { %v1304_v61 = vpop.f32.mrf.mxu3 }
 0x24e   : > { %v1305_v62 = vadd.f32 %v1885_v33, %v1304_v61 }
 0x250   : > { %1357 = vst.msk [vmem:[%s1891_s17 + $0x98] sm:$0xff] %vm1337_vm2, %v1305_v62 }
 0x255   : > { %v1307_v0 = vpop.f32.mrf.mxu3 }
 0x256   : > { %v1308_v1 = vadd.f32 %v1885_v33, %v1307_v0 }
 0x258   : > { %1358 = vst.msk [vmem:[%s1891_s17 + $0xa0] sm:$0xff] %vm1337_vm2, %v1308_v1 }
 0x25d   : > { %v1309_v2 = vpop.f32.mrf.mxu3 }
 0x25e   : > { %v1310_v3 = vadd.f32 %v1885_v33, %v1309_v2 }
 0x260   : > { %1359 = vst.msk [vmem:[%s1891_s17 + $0xa8] sm:$0xff] %vm1337_vm2, %v1310_v3 }
 0x265   : > { %v1312_v4 = vpop.f32.mrf.mxu3 }
 0x266   : > { %v1313_v5 = vadd.f32 %v1885_v33, %v1312_v4 }
 0x268   : > { %1360 = vst.msk [vmem:[%s1891_s17 + $0xb0] sm:$0xff] %vm1337_vm2, %v1313_v5 }
 0x26d   : > { %v1314_v6 = vpop.f32.mrf.mxu3 }
 0x26e   : > { %v1315_v7 = vadd.f32 %v1885_v33, %v1314_v6 }
 0x270   : > { %1361 = vst.msk [vmem:[%s1891_s17 + $0xb8] sm:$0xff] %vm1337_vm2, %v1315_v7 }
 0x275   : > { %v1317_v8 = vpop.f32.mrf.mxu3 }
 0x276   : > { %v1318_v9 = vadd.f32 %v1885_v33, %v1317_v8 }
 0x278   : > { %1362 = vst.msk [vmem:[%s1891_s17 + $0xc0] sm:$0xff] %vm1337_vm2, %v1318_v9 }
 0x27d   : > { %v1319_v10 = vpop.f32.mrf.mxu3 }
 0x27e   : > { %v1320_v11 = vadd.f32 %v1885_v33, %v1319_v10 }
 0x280   : > { %1363 = vst.msk [vmem:[%s1891_s17 + $0xc8] sm:$0xff] %vm1337_vm2, %v1320_v11 }
 0x285   : > { %v1322_v12 = vpop.f32.mrf.mxu3 }
 0x286   : > { %v1323_v13 = vadd.f32 %v1885_v33, %v1322_v12 }
 0x288   : > { %1364 = vst.msk [vmem:[%s1891_s17 + $0xd0] sm:$0xff] %vm1337_vm2, %v1323_v13 }
 0x28d   : > { %v1324_v14 = vpop.f32.mrf.mxu3 }
 0x28e   : > { %v1325_v15 = vadd.f32 %v1885_v33, %v1324_v14 }
 0x290   : > { %1365 = vst.msk [vmem:[%s1891_s17 + $0xd8] sm:$0xff] %vm1337_vm2, %v1325_v15 }
 0x295   : > { %v1327_v16 = vpop.f32.mrf.mxu3 }
 0x296   : > { %v1328_v17 = vadd.f32 %v1885_v33, %v1327_v16 }
 0x298   : > { %1366 = vst.msk [vmem:[%s1891_s17 + $0xe0] sm:$0xff] %vm1337_vm2, %v1328_v17 }
 0x29d   : > { %v1329_v18 = vpop.f32.mrf.mxu3 }
 0x29e   : > { %v1330_v19 = vadd.f32 %v1885_v33, %v1329_v18 }
 0x2a0   : > { %1367 = vst.msk [vmem:[%s1891_s17 + $0xe8] sm:$0xff] %vm1337_vm2, %v1330_v19 }
 0x2a5   : > { %v1332_v20 = vpop.f32.mrf.mxu3 }
 0x2a6   : > { %v1333_v21 = vadd.f32 %v1885_v33, %v1332_v20 }
 0x2a8   : > { %1368 = vst.msk [vmem:[%s1891_s17 + $0xf0] sm:$0xff] %vm1337_vm2, %v1333_v21 }
 0x2ad   : > { %v1334_v22 = vpop.f32.mrf.mxu3 }
 0x2ae   : > { %v1335_v23 = vadd.f32 %v1885_v33, %v1334_v22 }
 0x2b0   : > { %1369 = vst.msk [vmem:[%s1891_s17 + $0xf8] sm:$0xff] %vm1337_vm2, %v1335_v23 }
 0x2b1 PF: > { %s19_s30 = sadd.s32 1, %s1594_s30  }
 0x2b2   : > { %p16_p4 = scmp.ge.s32.totalorder %s19_s30, 4  }
 0x2b4   :  { %18 = sbr.rel (!%p16_p4) target bundleno = 1 (0x1), region = 89 }

</bundles_post_ra>
